<compile_context>
chip_gen: v5e
topology: v5e:2x2
jax: 0.10.0
libtpu: 0.0.40
codegen_flags: <defaults>
</compile_context>

<pallas_src>
import functools

import jax
import jax.numpy as jnp
from jax import lax
from jax.experimental import pallas as pl
from jax.experimental.pallas import tpu as pltpu

_LANE = 128
_MAX_TILE_M = 32768        # lane-tile cap (review: allow wide tiles)
_PAD_LOGIT = -1e4          # exp(-1e4) == 0 and sigmoid(-1e4) == 0 exactly in f32


def _bce_dice_kernel(x_ref, t_ref, bce_ref, inter_ref, den_ref,
                     *, tile_m, k_tiles, hw_eff, ragged):
    k = pl.program_id(1)

    @pl.when(k == 0)
    def _init():
        bce_ref[...] = jnp.zeros_like(bce_ref)
        inter_ref[...] = jnp.zeros_like(inter_ref)
        den_ref[...] = jnp.zeros_like(den_ref)

    x = x_ref[...].astype(jnp.float32)        # (rows, tile_m) logits
    t = t_ref[...].astype(jnp.float32)        # (rows, tile_m) targets

    if ragged:
        # In-kernel mask of the ragged tail (no HBM padding pass).  Masked
        # columns get logit=-1e4 / target=0 -> exactly 0 contribution.
        base = (pl.program_id(0) * k_tiles + k) * tile_m
        col = base + lax.broadcasted_iota(jnp.int32, x.shape, 1)
        valid = col < hw_eff
        x = jnp.where(valid, x, _PAD_LOGIT)
        t = jnp.where(valid, t, 0.0)

    # One EUP transcendental shared by stable BCE and sigmoid.
    e = jnp.exp(-jnp.abs(x))
    one_plus_e = 1.0 + e

    # BCEWithLogitsLoss elementwise: max(x,0) - x*t + log(1 + exp(-|x|)).
    bce_elem = jnp.maximum(x, 0.0) - x * t + jnp.log1p(e)

    # sigmoid(x) = where(x>=0, 1, e) / (1+e): approx EUP reciprocal plus one
    # Newton-Raphson step on the VALU (rel. error ~2^-24, within test tol).
    r = pl.reciprocal(one_plus_e, approx=True)
    r = r * (2.0 - one_plus_e * r)
    p = jnp.where(x >= 0.0, 1.0, e) * r

    # Per-tile lane reductions (idle XLU) into tiny per-row accumulators that
    # live in the VMEM-resident output blocks (accumulated across k).
    bce_ref[0] += jnp.sum(bce_elem, axis=-1, keepdims=True)
    inter_ref[0] += jnp.sum(p * t, axis=-1, keepdims=True)
    den_ref[0] += jnp.sum(p * p + t * t, axis=-1, keepdims=True)


def bce_dice_loss(logits, target, alpha=1.0, beta=1.0, eps=1e-6):
    """alpha * BCEWithLogitsLoss(logits, target) + beta * DiceLoss(logits, target)."""
    assert logits.shape == target.shape
    n, c = int(logits.shape[0]), int(logits.shape[1])
    hw = 1
    for d in logits.shape[2:]:
        hw *= int(d)
    nc = n * c

    if not jnp.issubdtype(target.dtype, jnp.floating):
        target = target.astype(jnp.float32)

    # Sublane fold: fill the 8 sublanes when nc < 8 (contiguous reshape only).
    fold = 1
    while nc * fold < 8 and hw % (fold * 2) == 0:
        fold *= 2
    rows = nc * fold
    hw_eff = hw // fold

    # (N, C, *spatial) -> (rows, hw_eff): contiguous reshape, no transpose, no pad.
    x = logits.reshape(rows, hw_eff)
    t = target.reshape(rows, hw_eff)

    # --- VMEM budget / tile sizing (inputs are the only large buffers) -------
    try:
        vmem_cap = int(pltpu.get_tpu_info().vmem_capacity_bytes)
    except Exception:  # pragma: no cover - conservative fallback
        vmem_cap = 128 * 1024 * 1024
    vmem_limit = int(min(48 * 1024 * 1024, (vmem_cap * 3) // 4))
    buf_budget = max(4 * 1024 * 1024, vmem_limit - 4 * 1024 * 1024)
    per_col = 2 * rows * (jnp.dtype(x.dtype).itemsize + jnp.dtype(t.dtype).itemsize)
    tile_cap = int(min(_MAX_TILE_M, max(_LANE, buf_budget // per_col)))

    if hw_eff <= tile_cap:
        # Single block covering the full (possibly unaligned) HW extent.
        tile_m, k_tiles, n_split, ragged = hw_eff, 1, 1, False
    else:
        tile_m = (tile_cap // _LANE) * _LANE
        tiles_total = pl.cdiv(hw_eff, tile_m)
        ragged = (hw_eff % tile_m) != 0
        # v7x: split the HW tile range over the two TensorCores when it divides.
        n_split = 2 if (tiles_total % 2 == 0) else 1
        k_tiles = tiles_total // n_split

    # Guard: never request less VMEM than the double-buffered inputs need.
    need = per_col * tile_m + (1 << 20)
    if need > vmem_limit:
        vmem_limit = int(min(need, (vmem_cap * 7) // 8))

    kernel = functools.partial(
        _bce_dice_kernel, tile_m=tile_m, k_tiles=k_tiles,
        hw_eff=hw_eff, ragged=ragged)

    part_shape = jax.ShapeDtypeStruct((n_split, rows, 1), jnp.float32)
    part_spec = pl.BlockSpec((1, rows, 1), lambda s, k: (s, 0, 0))
    in_spec = pl.BlockSpec((rows, tile_m), lambda s, k: (0, s * k_tiles + k))

    bce_rows, inter_rows, den_rows = pl.pallas_call(
        kernel,
        out_shape=(part_shape, part_shape, part_shape),
        grid_spec=pltpu.PrefetchScalarGridSpec(
            num_scalar_prefetch=0,
            grid=(n_split, k_tiles),
            in_specs=[in_spec, in_spec],
            out_specs=(part_spec, part_spec, part_spec),
        ),
        compiler_params=pltpu.CompilerParams(
            dimension_semantics=("parallel", "arbitrary"),
            vmem_limit_bytes=vmem_limit),
    )(x, t)

    # Tiny final combine (per-channel dice ratio + scalar mix) in plain JAX.
    bce_mean = jnp.sum(bce_rows) / float(n * c * hw)
    inter_c = jnp.sum(inter_rows.reshape(n_split, n, c, fold), axis=(0, 1, 3))
    den_c = jnp.sum(den_rows.reshape(n_split, n, c, fold), axis=(0, 1, 3))
    dice = 2.0 * inter_c / jnp.maximum(den_c, eps)
    dice_loss = 1.0 - jnp.mean(dice)
    return alpha * bce_mean + beta * dice_loss


def _reference_bce_dice(logits, target, alpha=1.0, beta=1.0, eps=1e-6):
    x = logits.astype(jnp.float32)
    t = target.astype(jnp.float32)
    bce = jnp.mean(jnp.maximum(x, 0.0) - x * t + jnp.log1p(jnp.exp(-jnp.abs(x))))
    c = x.shape[1]
    perm = (1, 0) + tuple(range(2, x.ndim))
    xf = jnp.transpose(x, perm).reshape(c, -1)
    tf = jnp.transpose(t, perm).reshape(c, -1)
    p = jax.nn.sigmoid(xf)
    intersect = jnp.sum(p * tf, axis=-1)
    denom = jnp.sum(p * p, axis=-1) + jnp.sum(tf * tf, axis=-1)
    dice = 2.0 * intersect / jnp.maximum(denom, eps)
    return alpha * bce + beta * (1.0 - jnp.mean(dice))


if __name__ == "__main__":
    # Deterministic "parameters" of BCEDiceLoss.__init__(alpha, beta):
    alpha, beta = 1.0, 1.0

    key = jax.random.PRNGKey(0)
    k1, k2, k3, k4 = jax.random.split(key, 4)

    # Primary NCHW case, consistent with the PyTorch module.
    logits = jax.random.normal(k1, (2, 4, 16, 16), dtype=jnp.float32)
    target = jax.random.bernoulli(k2, p=0.5, shape=(2, 4, 16, 16)).astype(jnp.float32)
    loss = jax.block_until_ready(bce_dice_loss(logits, target, alpha=alpha, beta=beta))
    ref = _reference_bce_dice(logits, target, alpha=alpha, beta=beta)
    assert jnp.allclose(loss, ref, atol=1e-5, rtol=1e-5), (loss, ref)

    # Small-NC case exercising the sublane-fold path (nc < 8).
    logits2 = jax.random.normal(k3, (1, 1, 16, 16), dtype=jnp.float32)
    target2 = jax.random.bernoulli(k4, p=0.5, shape=(1, 1, 16, 16)).astype(jnp.float32)
    loss2 = jax.block_until_ready(bce_dice_loss(logits2, target2, alpha=alpha, beta=beta))
    ref2 = _reference_bce_dice(logits2, target2, alpha=alpha, beta=beta)
    assert jnp.allclose(loss2, ref2, atol=1e-5, rtol=1e-5), (loss2, ref2)

    print("KERNEL_OK")
</pallas_src>

<mosaic_0001>
module attributes {stable_mosaic.version = 11 : i64} {
  func.func @_bce_dice_kernel(%arg0: i32, %arg1: i32, %arg2: memref<8x256xf32, #tpu.memory_space<vmem>>, %arg3: memref<8x256xf32, #tpu.memory_space<vmem>>, %arg4: memref<1x8x1xf32, #tpu.memory_space<vmem>>, %arg5: memref<1x8x1xf32, #tpu.memory_space<vmem>>, %arg6: memref<1x8x1xf32, #tpu.memory_space<vmem>>) attributes {dimension_semantics = [#tpu.dimension_semantics<parallel>, #tpu.dimension_semantics<arbitrary>], iteration_bounds = array<i64: 1, 1>, scalar_prefetch = 0 : i64, scratch_operands = 0 : i64, tpu.core_type = #tpu.core_type<tc>, window_params = [{transform_indices = @transform_0, window_bounds = array<i64: 8, 256>}, {transform_indices = @transform_1, window_bounds = array<i64: 8, 256>}, {transform_indices = @transform_2, window_bounds = array<i64: 1, 8, 1>}, {transform_indices = @transform_3, window_bounds = array<i64: 1, 8, 1>}, {transform_indices = @transform_4, window_bounds = array<i64: 1, 8, 1>}]} {
    %c0_i32 = arith.constant 0 : i32
    %0 = arith.cmpi eq, %arg1, %c0_i32 : i32
    %1 = arith.extui %0 : i1 to i32
    %c0_i32_0 = arith.constant 0 : i32
    %2 = arith.cmpi ne, %1, %c0_i32_0 : i32
    scf.if %2 {
      %cst_30 = arith.constant 0.000000e+00 : f32
      %55 = vector.broadcast %cst_30 : f32 to vector<1x8x1xf32>
      %c0_31 = arith.constant 0 : index
      %c0_32 = arith.constant 0 : index
      %c0_33 = arith.constant 0 : index
      %56 = vector.load %arg4[%c0_31, %c0_32, %c0_33] : memref<1x8x1xf32, #tpu.memory_space<vmem>>, vector<1x8x1xf32>
      tpu.vector_store %arg4[%c0_31, %c0_32, %c0_33], %55 {strides = array<i32>} : memref<1x8x1xf32, #tpu.memory_space<vmem>>, vector<1x8x1xf32>,
      %cst_34 = arith.constant 0.000000e+00 : f32
      %57 = vector.broadcast %cst_34 : f32 to vector<1x8x1xf32>
      %c0_35 = arith.constant 0 : index
      %c0_36 = arith.constant 0 : index
      %c0_37 = arith.constant 0 : index
      %58 = vector.load %arg5[%c0_35, %c0_36, %c0_37] : memref<1x8x1xf32, #tpu.memory_space<vmem>>, vector<1x8x1xf32>
      tpu.vector_store %arg5[%c0_35, %c0_36, %c0_37], %57 {strides = array<i32>} : memref<1x8x1xf32, #tpu.memory_space<vmem>>, vector<1x8x1xf32>,
      %cst_38 = arith.constant 0.000000e+00 : f32
      %59 = vector.broadcast %cst_38 : f32 to vector<1x8x1xf32>
      %c0_39 = arith.constant 0 : index
      %c0_40 = arith.constant 0 : index
      %c0_41 = arith.constant 0 : index
      %60 = vector.load %arg6[%c0_39, %c0_40, %c0_41] : memref<1x8x1xf32, #tpu.memory_space<vmem>>, vector<1x8x1xf32>
      tpu.vector_store %arg6[%c0_39, %c0_40, %c0_41], %59 {strides = array<i32>} : memref<1x8x1xf32, #tpu.memory_space<vmem>>, vector<1x8x1xf32>,
    } else {
    }
    %c0 = arith.constant 0 : index
    %c0_1 = arith.constant 0 : index
    %3 = vector.load %arg2[%c0, %c0_1] : memref<8x256xf32, #tpu.memory_space<vmem>>, vector<8x256xf32>
    %c0_2 = arith.constant 0 : index
    %c0_3 = arith.constant 0 : index
    %4 = vector.load %arg3[%c0_2, %c0_3] : memref<8x256xf32, #tpu.memory_space<vmem>>, vector<8x256xf32>
    %5 = math.absf %3 : vector<8x256xf32>
    %cst = arith.constant 0.000000e+00 : f32
    %6 = vector.broadcast %cst : f32 to vector<8x256xf32>
    %7 = arith.subf %6, %5 : vector<8x256xf32>
    %8 = math.exp %7 : vector<8x256xf32>
    %cst_4 = arith.constant 1.000000e+00 : f32
    %9 = vector.broadcast %cst_4 : f32 to vector<8x256xf32>
    %10 = arith.addf %9, %8 : vector<8x256xf32>
    %cst_5 = arith.constant 0.000000e+00 : f32
    %11 = vector.broadcast %cst_5 : f32 to vector<8x256xf32>
    %12 = arith.maximumf %3, %11 : vector<8x256xf32>
    %13 = arith.mulf %3, %4 : vector<8x256xf32>
    %14 = arith.subf %12, %13 : vector<8x256xf32>
    %15 = math.log1p %8 : vector<8x256xf32>
    %16 = arith.addf %14, %15 : vector<8x256xf32>
    %17 = tpu.reciprocal %10 {approx = true} : vector<8x256xf32> -> vector<8x256xf32>
    %18 = arith.mulf %10, %17 : vector<8x256xf32>
    %cst_6 = arith.constant 2.000000e+00 : f32
    %19 = vector.broadcast %cst_6 : f32 to vector<8x256xf32>
    %20 = arith.subf %19, %18 : vector<8x256xf32>
    %21 = arith.mulf %17, %20 : vector<8x256xf32>
    %cst_7 = arith.constant 0.000000e+00 : f32
    %22 = vector.broadcast %cst_7 : f32 to vector<8x256xf32>
    %23 = arith.cmpf oge, %3, %22 : vector<8x256xf32>
    %cst_8 = arith.constant 1.000000e+00 : f32
    %24 = vector.broadcast %cst_8 : f32 to vector<8x256xf32>
    %25 = arith.select %23, %24, %8 : vector<8x256xi1>, vector<8x256xf32>
    %26 = arith.mulf %25, %21 : vector<8x256xf32>
    %c0_9 = arith.constant 0 : index
    %c0_10 = arith.constant 0 : index
    %c0_11 = arith.constant 0 : index
    %27 = vector.load %arg4[%c0_9, %c0_10, %c0_11] : memref<1x8x1xf32, #tpu.memory_space<vmem>>, vector<1x8x1xf32>
    %28 = vector.shape_cast %27 : vector<1x8x1xf32> to vector<8x1xf32>
    %cst_12 = arith.constant dense<0.000000e+00> : vector<8xf32>
    %29 = vector.multi_reduction <add>, %16, %cst_12 [1] : vector<8x256xf32> to vector<8xf32>
    %30 = vector.shape_cast %29 : vector<8xf32> to vector<8x1xf32>
    %31 = arith.addf %28, %30 : vector<8x1xf32>
    %c0_13 = arith.constant 0 : index
    %c0_14 = arith.constant 0 : index
    %c0_15 = arith.constant 0 : index
    %32 = vector.load %arg4[%c0_13, %c0_14, %c0_15] : memref<1x8x1xf32, #tpu.memory_space<vmem>>, vector<1x8x1xf32>
    %33 = vector.shape_cast %32 : vector<1x8x1xf32> to vector<8x1xf32>
    %34 = vector.shape_cast %31 : vector<8x1xf32> to vector<1x8x1xf32>
    tpu.vector_store %arg4[%c0_13, %c0_14, %c0_15], %34 {strides = array<i32>} : memref<1x8x1xf32, #tpu.memory_space<vmem>>, vector<1x8x1xf32>,
    %c0_16 = arith.constant 0 : index
    %c0_17 = arith.constant 0 : index
    %c0_18 = arith.constant 0 : index
    %35 = vector.load %arg5[%c0_16, %c0_17, %c0_18] : memref<1x8x1xf32, #tpu.memory_space<vmem>>, vector<1x8x1xf32>
    %36 = vector.shape_cast %35 : vector<1x8x1xf32> to vector<8x1xf32>
    %37 = arith.mulf %26, %4 : vector<8x256xf32>
    %cst_19 = arith.constant dense<0.000000e+00> : vector<8xf32>
    %38 = vector.multi_reduction <add>, %37, %cst_19 [1] : vector<8x256xf32> to vector<8xf32>
    %39 = vector.shape_cast %38 : vector<8xf32> to vector<8x1xf32>
    %40 = arith.addf %36, %39 : vector<8x1xf32>
    %c0_20 = arith.constant 0 : index
    %c0_21 = arith.constant 0 : index
    %c0_22 = arith.constant 0 : index
    %41 = vector.load %arg5[%c0_20, %c0_21, %c0_22] : memref<1x8x1xf32, #tpu.memory_space<vmem>>, vector<1x8x1xf32>
    %42 = vector.shape_cast %41 : vector<1x8x1xf32> to vector<8x1xf32>
    %43 = vector.shape_cast %40 : vector<8x1xf32> to vector<1x8x1xf32>
    tpu.vector_store %arg5[%c0_20, %c0_21, %c0_22], %43 {strides = array<i32>} : memref<1x8x1xf32, #tpu.memory_space<vmem>>, vector<1x8x1xf32>,
    %c0_23 = arith.constant 0 : index
    %c0_24 = arith.constant 0 : index
    %c0_25 = arith.constant 0 : index
    %44 = vector.load %arg6[%c0_23, %c0_24, %c0_25] : memref<1x8x1xf32, #tpu.memory_space<vmem>>, vector<1x8x1xf32>
    %45 = vector.shape_cast %44 : vector<1x8x1xf32> to vector<8x1xf32>
    %46 = arith.mulf %26, %26 : vector<8x256xf32>
    %47 = arith.mulf %4, %4 : vector<8x256xf32>
    %48 = arith.addf %46, %47 : vector<8x256xf32>
    %cst_26 = arith.constant dense<0.000000e+00> : vector<8xf32>
    %49 = vector.multi_reduction <add>, %48, %cst_26 [1] : vector<8x256xf32> to vector<8xf32>
    %50 = vector.shape_cast %49 : vector<8xf32> to vector<8x1xf32>
    %51 = arith.addf %45, %50 : vector<8x1xf32>
    %c0_27 = arith.constant 0 : index
    %c0_28 = arith.constant 0 : index
    %c0_29 = arith.constant 0 : index
    %52 = vector.load %arg6[%c0_27, %c0_28, %c0_29] : memref<1x8x1xf32, #tpu.memory_space<vmem>>, vector<1x8x1xf32>
    %53 = vector.shape_cast %52 : vector<1x8x1xf32> to vector<8x1xf32>
    %54 = vector.shape_cast %51 : vector<8x1xf32> to vector<1x8x1xf32>
    tpu.vector_store %arg6[%c0_27, %c0_28, %c0_29], %54 {strides = array<i32>} : memref<1x8x1xf32, #tpu.memory_space<vmem>>, vector<1x8x1xf32>,
    return
  }
  func.func @transform_0(%arg0: i32, %arg1: i32) -> (i32, i32) {
    %c1_i32 = arith.constant 1 : i32
    %0 = arith.muli %arg0, %c1_i32 : i32
    %1 = arith.addi %0, %arg1 : i32
    %c0_i32 = arith.constant 0 : i32
    %c0_i32_0 = arith.constant 0 : i32
    return %c0_i32, %1 : i32, i32
  }
  func.func @transform_1(%arg0: i32, %arg1: i32) -> (i32, i32) {
    %c1_i32 = arith.constant 1 : i32
    %0 = arith.muli %arg0, %c1_i32 : i32
    %1 = arith.addi %0, %arg1 : i32
    %c0_i32 = arith.constant 0 : i32
    %c0_i32_0 = arith.constant 0 : i32
    return %c0_i32, %1 : i32, i32
  }
  func.func @transform_2(%arg0: i32, %arg1: i32) -> (i32, i32, i32) {
    %c0_i32 = arith.constant 0 : i32
    %c0_i32_0 = arith.constant 0 : i32
    %c0_i32_1 = arith.constant 0 : i32
    return %arg0, %c0_i32, %c0_i32_0 : i32, i32, i32
  }
  func.func @transform_3(%arg0: i32, %arg1: i32) -> (i32, i32, i32) {
    %c0_i32 = arith.constant 0 : i32
    %c0_i32_0 = arith.constant 0 : i32
    %c0_i32_1 = arith.constant 0 : i32
    return %arg0, %c0_i32, %c0_i32_0 : i32, i32, i32
  }
  func.func @transform_4(%arg0: i32, %arg1: i32) -> (i32, i32, i32) {
    %c0_i32 = arith.constant 0 : i32
    %c0_i32_0 = arith.constant 0 : i32
    %c0_i32_1 = arith.constant 0 : i32
    return %arg0, %c0_i32, %c0_i32_0 : i32, i32, i32
  }
}

</mosaic_0001>

<bundles_post_ra>
// kernel: tpu_custom_call.1
= control target key start
LH: loop header
LB: loop body
LE: loop exit
PB: predicated region body
PF: predicated region fallthrough
CT: control target
= control target key end

     0   :  { %10 = vsyncpa [#allocation3], 0  ;;  %s291_s0 = inlined_call_operand.hbm [shape: f32[8,256], index: 0, kind: input, shape index: {}]   ;;  %s292_s1 = inlined_call_operand.hbm [shape: f32[8,256], index: 1, kind: input, shape index: {}]   ;;  %s293_s2 = inlined_call_operand.vmem [shape: f32[1,8,1], index: 2, kind: output, shape index: {0}]   ;;  %s294_s3 = inlined_call_operand.vmem [shape: f32[1,8,1], index: 3, kind: output, shape index: {1}]   ;;  %s295_s4 = inlined_call_operand.vmem [shape: f32[1,8,1], index: 4, kind: output, shape index: {2}]  }
   0x1   :  { %s21_s17 = sshll.u32 %s291_s0, 4  ;;  %s22_s17 = int_to_ptr.hbm [resolvable:$true] %s21_s17 }
   0x2   :  { %11 = vsyncpa [#allocation5], 0  ;;  %s224_s18 = smov [#allocation2]   ;;  %s36_s22 = sshll.u32 %s292_s1, 4  ;;  %s37_s22 = int_to_ptr.hbm [resolvable:$true] %s36_s22 }
   0x3   :  { %s23_s19 = sshll.u32 %s224_s18, 4  ;;  %s225_s23 = smov [#allocation4]   ;;  %s24_s19 = int_to_ptr.vmem [resolvable:$true] %s23_s19 }
   0x4   :  { %26 = dma.hbm_to_vmem [thread:$0]  %s22_s17, 256, %s24_s19, [#allocation3]  }
   0x5   :  { %s38_s24 = sshll.u32 %s225_s23, 4  ;;  %s39_s24 = int_to_ptr.vmem [resolvable:$true] %s38_s24 }
   0x6   :  { %41 = dma.hbm_to_vmem [thread:$0]  %s37_s22, 256, %s39_s24, [#allocation5]  }
   0x7   :  { %220 = dma.done.wait [#allocation3], 256  }
   0x8   :  { %221 = vsyncadd [#allocation3], 4294967040 }
   0x9   :  { %222 = dma.done.wait [#allocation5], 256  }
   0xa   :  { %223 = vsyncadd [#allocation5], 4294967040  ;;  %v62_v0 = vld [vmem:[#allocation2] sm:$0xff]  ;;  %v63_v1 = vld [vmem:[#allocation2 + $0x8] sm:$0xff]  ;;  %vm58_vm0 = vcmask 7168   ;;  %v226_v8 = vmov 0.0  }
   0xb   :  { %v66_v2 = vand.u32 2147483647, %v62_v0  ;;  %v67_v3 = vand.u32 2147483647, %v63_v1  ;;  %59 = vst.msk [vmem:[%s293_s2] sm:$0xff] %vm58_vm0, %v226_v8  ;;  %v64_v13 = vld [vmem:[#allocation4] sm:$0xff] }
   0xc   :  { %60 = vst.msk [vmem:[%s294_s3] sm:$0xff] %vm58_vm0, %v226_v8  ;;  %v65_v16 = vld [vmem:[#allocation4 + $0x8] sm:$0xff]  ;;  %v76_v17 = vmax.f32 %v62_v0, 0.0  ;;  %v78_v19 = vmul.f32 %v64_v13, %v62_v0  ;;  %v77_v22 = vmax.f32 %v63_v1, 0.0  ;;  %vm110_vm3 = vcmp.ge.f32.partialorder %v62_v0, 0.0 }
   0xd   :  { %v68_v4 = vsub.f32 0.0, %v66_v2  ;;  %v69_v5 = vsub.f32 0.0, %v67_v3  ;;  %61 = vst.msk [vmem:[%s295_s4] sm:$0xff] %vm58_vm0, %v226_v8  ;;  %v79_v23 = vmul.f32 %v65_v16, %v63_v1  ;;  %vm111_vm4 = vcmp.ge.f32.partialorder %v63_v1, 0.0 }
   0xe   :  { %v80_v27 = vsub.f32 %v76_v17, %v78_v19  ;;  %v134_v49 = vmul.f32 %v64_v13, %v64_v13  ;;  %v135_v51 = vmul.f32 %v65_v16, %v65_v16 }
   0xf   :  { %v70_v6 = vmul.f32 1.442695, %v68_v4  ;;  %v72_v7 = vmul.f32 1.442695, %v69_v5  ;;  %v81_v30 = vsub.f32 %v77_v22, %v79_v23 }
  0x11   :  { %160 = vpow2.f32 %v70_v6 }
  0x12   :  { %162 = vpow2.f32 %v72_v7  ;;  %v116_v60 = vld [vmem:[%s293_s2] sm:$0xff] }
  0x13   :  { %v123_v63 = vld [vmem:[%s294_s3] sm:$0xff] }
  0x14   :  { %v131_v0 = vld [vmem:[%s295_s4] sm:$0xff] }
  0x17   :  { %v161_v9 = vpop.eup %160 }
  0x18   :  { %v163_v10 = vpop.eup %162  ;;  %v74_v11 = vadd.f32 1.0, %v161_v9  ;;  %v85_v12 = vmul.f32 -0.5, %v161_v9  ;;  %v88_v20 = vand.u32 2147483647, %v161_v9  ;;  %v112_v43 = vsel %vm110_vm3, 1.0, %v161_v9 }
  0x19   :  { %v75_v14 = vadd.f32 1.0, %v163_v10  ;;  %v94_v15 = vmul.f32 -0.5, %v163_v10  ;;  %v97_v24 = vand.u32 2147483647, %v163_v10  ;;  %v113_v46 = vsel %vm111_vm4, 1.0, %v163_v10 }
  0x1a   :  { %164 = vlog2.f32 %v74_v11  ;;  %v86_v18 = vadd.f32 1.0, %v85_v12  ;;  %vm89_vm1 = vcmp.lt.f32.partialorder %v88_v20, 0.0004427343 }
  0x1b   :  { %166 = vlog2.f32 %v75_v14  ;;  %v95_v21 = vadd.f32 1.0, %v94_v15  ;;  %vm98_vm2 = vcmp.lt.f32.partialorder %v97_v24, 0.0004427343 }
  0x1c   :  { %168 = vrcp.f32 %v74_v11  ;;  %v87_v25 = vmul.f32 %v161_v9, %v86_v18 }
  0x1d   :  { %170 = vrcp.f32 %v75_v14  ;;  %v96_v28 = vmul.f32 %v163_v10, %v95_v21 }
  0x20   :  { %v165_v26 = vpop.eup %164 }
  0x21   :  { %v167_v29 = vpop.eup %166  ;;  %v84_v31 = vmul.f32 0.6931472, %v165_v26 }
  0x22   :  { %v169_v32 = vpop.eup %168  ;;  %v93_v33 = vmul.f32 0.6931472, %v167_v29 }
  0x23   :  { %v171_v34 = vpop.eup %170  ;;  %v90_v35 = vsel %vm89_vm1, %v87_v25, %v84_v31  ;;  %v104_v36 = vmul.f32 %v169_v32, %v74_v11 }
  0x24   :  { %v99_v37 = vsel %vm98_vm2, %v96_v28, %v93_v33  ;;  %v100_v38 = vadd.f32 %v90_v35, %v80_v27  ;;  %v105_v39 = vmul.f32 %v171_v34, %v75_v14 }
  0x25   :  { %v101_v40 = vadd.f32 %v99_v37, %v81_v30  ;;  %v106_v41 = vsub.f32 2.0, %v104_v36 }
  0x26   :  { %v107_v42 = vsub.f32 2.0, %v105_v39 }
  0x27   :  { %v117_v44 = vadd.f32 %v101_v40, %v100_v38  ;;  %v108_v45 = vmul.f32 %v169_v32, %v106_v41 }
  0x28   :  { %v109_v47 = vmul.f32 %v171_v34, %v107_v42 }
  0x29   :  { %118 = vadd.xlane.f32.xlu0 %v117_v44  ;;  %v114_v48 = vmul.f32 %v112_v43, %v108_v45 }
  0x2a   :  { %v115_v50 = vmul.f32 %v113_v46, %v109_v47 }
  0x2b   :  { %v132_v52 = vmul.f32 %v114_v48, %v114_v48  ;;  %v124_v53 = vmul.f32 %v114_v48, %v64_v13 }
  0x2c   :  { %v133_v54 = vmul.f32 %v115_v50, %v115_v50  ;;  %v125_v55 = vmul.f32 %v115_v50, %v65_v16 }
  0x2d   :  { %v136_v56 = vadd.f32 %v134_v49, %v132_v52 }
  0x2e   :  { %v137_v57 = vadd.f32 %v135_v51, %v133_v54  ;;  %v126_v58 = vadd.f32 %v125_v55, %v124_v53 }
  0x30   :  { %v138_v59 = vadd.f32 %v137_v57, %v136_v56 }
  0x31   :  { %127 = vadd.xlane.f32.xlu0 %v126_v58 }
  0x32   :  { %139 = vadd.xlane.f32.xlu1 %v138_v59 }
  0x9c   :  { %v119_v61 = vpop.xlane.xlu0 %118 }
  0x9d   :  { %v120_v62 = vadd.f32 %v119_v61, %v116_v60 }
  0x9f   :  { %122 = vst.msk [vmem:[%s293_s2] sm:$0xff] %vm58_vm0, %v120_v62 }
  0xa4   :  { %v128_v1 = vpop.xlane.xlu0 %127 }
  0xa5   :  { %v140_v2 = vpop.xlane.xlu1 %139  ;;  %v129_v3 = vadd.f32 %v128_v1, %v123_v63 }
  0xa6   :  { %v141_v4 = vadd.f32 %v140_v2, %v131_v0 }
  0xa7   :  { %130 = vst.msk [vmem:[%s294_s3] sm:$0xff] %vm58_vm0, %v129_v3 }
  0xa8   :  { %142 = vst.msk [vmem:[%s295_s4] sm:$0xff] %vm58_vm0, %v141_v4 }
  0xa9   :  { %155 = vsyncpa [#allocation3], 1 }
  0xaa   :  { %156 = vsyncpa [#allocation5], 1 }

</bundles_post_ra>
